<compile_context>
chip_gen: v7x
topology: tpu7x:2x2x1
jax: 0.10.0
libtpu: 0.0.40
codegen_flags: <defaults>
</compile_context>

<pallas_src>
import jax
import jax.numpy as jnp
import numpy as np
from jax import lax
from jax.experimental import pallas as pl
from jax.experimental.pallas import tpu as pltpu

# ----------------------------- model dims (small synthetic) -----------------------------
SEQ_LEN = 8        # T
BATCH = 2          # B
EMBED_DIM = 32     # E
NUM_HEADS = 4      # H
HEAD_DIM = EMBED_DIM // NUM_HEADS
FFN_DIM = 64       # F
LN_EPS = 1e-5


def _layer_norm(z, gamma, beta):
    mu = jnp.mean(z, axis=-1, keepdims=True)
    var = jnp.mean((z - mu) * (z - mu), axis=-1, keepdims=True)
    return (z - mu) * lax.rsqrt(var + LN_EPS) * gamma + beta


# ----------------------------------- Pallas kernel --------------------------------------
# One grid step == one batch example (grid axis is "parallel" -> megacore-shardable).
def _encoder_layer_kernel(
    x_ref,                 # (T, E) f32 — rows of example b
    wqkv_ref, bqkv_ref,    # (E, 3E) bf16, (1, 3E) f32   (Wq / bq pre-scaled by Dh**-0.5)
    wo_ref, bo_ref,        # (E, E) bf16, (1, E) f32
    g1_ref, be1_ref,       # self_attn_layer_norm gamma/beta (1, E) f32
    w1_ref, b1_ref,        # fc1 (E, F) bf16, (1, F) f32
    w2_ref, b2_ref,        # fc2 (F, E) bf16, (1, E) f32
    g2_ref, be2_ref,       # final_layer_norm gamma/beta (1, E) f32
    out_ref,               # (T, E) f32
    attn_ref,              # (1, T, T) f32  head-averaged attention probs
):
    T, E, H, Dh = SEQ_LEN, EMBED_DIM, NUM_HEADS, HEAD_DIM

    x = x_ref[...]                                               # (T, E) f32

    # Fused QKV projection: one MXU push (bf16 operands, f32 accumulation).
    qkv = jnp.dot(x.astype(jnp.bfloat16), wqkv_ref[...],
                  preferred_element_type=jnp.float32) + bqkv_ref[...]     # (T, 3E) f32

    # Single layout shuffle for q, k and v together:
    # (T, 3E) -> (3E, T) -> (3H, Dh, T)  (2-D transpose + leading-dim split).
    qkv_hdT = qkv.T.reshape(3 * H, Dh, T)                        # (3H, Dh, T)
    k_hdT = qkv_hdT[H:2 * H].astype(jnp.bfloat16)                # (H, Dh, T)
    v_hdT = qkv_hdT[2 * H:].astype(jnp.bfloat16)                 # (H, Dh, T)
    q_h = jnp.transpose(qkv_hdT[:H], (0, 2, 1)).astype(jnp.bfloat16)   # (H, T, Dh)

    # scores: (H, T, Dh) x (H, Dh, T) -> (H, T, T)  — one batched dot over all heads.
    s = lax.dot_general(q_h, k_hdT, (((2,), (1,)), ((0,), (0,))),
                        preferred_element_type=jnp.float32)
    s = s - jnp.max(s, axis=-1, keepdims=True)
    p = jnp.exp(s)
    p = p * pl.reciprocal(jnp.sum(p, axis=-1, keepdims=True), approx=True)

    attn_ref[0] = jnp.mean(p, axis=0)                            # head-averaged (T, T)

    # context (transposed): (H, Dh, Tk) x (H, Tq, Tk) -> (H, Dh, Tq); one layout shuffle back.
    ctxT = lax.dot_general(v_hdT, p.astype(jnp.bfloat16), (((2,), (2,)), ((0,), (0,))),
                           preferred_element_type=jnp.float32)
    ctx = ctxT.reshape(E, T).T                                   # (T, E) f32

    attn_out = jnp.dot(ctx.astype(jnp.bfloat16), wo_ref[...],
                       preferred_element_type=jnp.float32) + bo_ref[...]

    # residual + self_attn_layer_norm (post-LN); dropout = identity in eval mode.
    y = _layer_norm(x + attn_out, g1_ref[...], be1_ref[...])

    # FFN: relu(fc1) -> fc2.
    h1 = jnp.maximum(
        jnp.dot(y.astype(jnp.bfloat16), w1_ref[...],
                preferred_element_type=jnp.float32) + b1_ref[...], 0.0)
    o = jnp.dot(h1.astype(jnp.bfloat16), w2_ref[...],
                preferred_element_type=jnp.float32) + b2_ref[...]

    # residual + final_layer_norm.
    out_ref[...] = _layer_norm(y + o, g2_ref[...], be2_ref[...])


def _cost_estimate(B, T, E, H, Dh, F):
    mm_flops = (2 * T * E * 3 * E          # fused QKV
                + 2 * H * T * T * Dh       # scores
                + 2 * H * T * T * Dh       # context
                + 2 * T * E * E            # out projection
                + 2 * T * E * F            # fc1
                + 2 * T * F * E)           # fc2
    transcendentals = B * (H * T * T + H * T + 2 * T)   # exp + reciprocal + rsqrt
    bytes_weights = 2 * (E * 3 * E + E * E + E * F + F * E)        # bf16 weights
    bytes_vecs = 4 * (3 * E + E + F + E + 4 * E)                   # f32 biases + LN params
    bytes_io = 4 * (2 * B * T * E + B * T * T)                     # x, out, attn
    return pl.CostEstimate(flops=B * mm_flops,
                           transcendentals=transcendentals,
                           bytes_accessed=bytes_weights + bytes_vecs + bytes_io)


# ------------------------------------- wrapper -------------------------------------------
@jax.jit
def transformer_sentence_encoder_layer(x_tbe, params):
    """x_tbe: (T, B, E) float32 -> (out (T, B, E), attn (B, T, T))."""
    T, B, E = x_tbe.shape
    F = FFN_DIM
    x_flat = jnp.transpose(x_tbe, (1, 0, 2)).reshape(B * T, E).astype(jnp.float32)

    scale = jnp.float32(HEAD_DIM ** -0.5)
    # Fuse QKV and fold the q scale into Wq / bq (free XLA-side plumbing); weights -> bf16.
    wqkv = jnp.concatenate([params["wq"] * scale, params["wk"], params["wv"]],
                           axis=1).astype(jnp.bfloat16)
    bqkv = jnp.concatenate([params["bq"] * scale, params["bk"], params["bv"]], axis=1)
    wo = params["wo"].astype(jnp.bfloat16)
    w1 = params["w1"].astype(jnp.bfloat16)
    w2 = params["w2"].astype(jnp.bfloat16)

    args = (
        x_flat, wqkv, bqkv,
        wo, params["bo"],
        params["g1"], params["be1"],
        w1, params["b1"],
        w2, params["b2"],
        params["g2"], params["be2"],
    )

    def resident(arr):
        # Same block index for every grid step -> DMA'd once, stays VMEM-resident.
        nd = arr.ndim
        return pl.BlockSpec(arr.shape, lambda b, _nd=nd: (0,) * _nd)

    in_specs = [pl.BlockSpec((T, E), lambda b: (b, 0))] + [resident(a) for a in args[1:]]
    out_specs = (
        pl.BlockSpec((T, E), lambda b: (b, 0)),
        pl.BlockSpec((1, T, T), lambda b: (b, 0, 0)),
    )

    out_flat, attn = pl.pallas_call(
        _encoder_layer_kernel,
        grid=(B,),
        out_shape=(
            jax.ShapeDtypeStruct((B * T, E), jnp.float32),
            jax.ShapeDtypeStruct((B, T, T), jnp.float32),
        ),
        in_specs=in_specs,
        out_specs=out_specs,
        compiler_params=pltpu.CompilerParams(dimension_semantics=("parallel",)),
        cost_estimate=_cost_estimate(B, T, E, NUM_HEADS, HEAD_DIM, F),
    )(*args)

    out = jnp.transpose(out_flat.reshape(B, T, E), (1, 0, 2))   # back to (T, B, E)
    return out, attn


# --------------------------------- pure-JAX reference ------------------------------------
def reference(x_tbe, p):
    x = jnp.transpose(x_tbe, (1, 0, 2))                          # (B, T, E)
    scale = HEAD_DIM ** -0.5
    q = (x @ p["wq"] + p["bq"]) * scale
    k = x @ p["wk"] + p["bk"]
    v = x @ p["wv"] + p["bv"]
    B, T, E = x.shape
    qh = q.reshape(B, T, NUM_HEADS, HEAD_DIM)
    kh = k.reshape(B, T, NUM_HEADS, HEAD_DIM)
    vh = v.reshape(B, T, NUM_HEADS, HEAD_DIM)
    s = jnp.einsum("bqhd,bkhd->bhqk", qh, kh)
    pr = jax.nn.softmax(s, axis=-1)
    ctx = jnp.einsum("bhqk,bkhd->bqhd", pr, vh).reshape(B, T, E)
    attn_out = ctx @ p["wo"] + p["bo"]

    def ln(z, g, b):
        mu = jnp.mean(z, -1, keepdims=True)
        var = jnp.mean((z - mu) ** 2, -1, keepdims=True)
        return (z - mu) * jax.lax.rsqrt(var + LN_EPS) * g + b

    y = ln(x + attn_out, p["g1"], p["be1"])
    h1 = jnp.maximum(y @ p["w1"] + p["b1"], 0.0)
    o = h1 @ p["w2"] + p["b2"]
    out = ln(y + o, p["g2"], p["be2"])
    return jnp.transpose(out, (1, 0, 2)), jnp.mean(pr, axis=1)


# --------------------------------------- main --------------------------------------------
def _make_params(key):
    ks = jax.random.split(key, 16)

    def lin(k, fan_in, fan_out):
        return jax.random.normal(k, (fan_in, fan_out), jnp.float32) * 0.05

    def vec(k, n, offset=0.0):
        return offset + jax.random.normal(k, (1, n), jnp.float32) * 0.05

    E, F = EMBED_DIM, FFN_DIM
    return {
        "wq": lin(ks[0], E, E), "bq": vec(ks[6], E),
        "wk": lin(ks[1], E, E), "bk": vec(ks[7], E),
        "wv": lin(ks[2], E, E), "bv": vec(ks[8], E),
        "wo": lin(ks[3], E, E), "bo": vec(ks[9], E),
        "g1": vec(ks[10], E, offset=1.0), "be1": vec(ks[11], E),
        "w1": lin(ks[4], E, F), "b1": vec(ks[12], F),
        "w2": lin(ks[5], F, E), "b2": vec(ks[13], E),
        "g2": vec(ks[14], E, offset=1.0), "be2": vec(ks[15], E),
    }


if __name__ == "__main__":
    key = jax.random.PRNGKey(0)
    kx, kp = jax.random.split(key)
    x = jax.random.normal(kx, (SEQ_LEN, BATCH, EMBED_DIM), jnp.float32)   # (T, B, E)
    params = _make_params(kp)

    out, attn = transformer_sentence_encoder_layer(x, params)
    out, attn = jax.block_until_ready((out, attn))

    ref_out, ref_attn = reference(x, params)
    # bf16 matmul operands (f32 accumulation) + approx EUP reciprocal => ~1e-3..1e-2 error
    # vs. the full-f32 reference; 2e-2 tolerance is ample and still catches structural bugs.
    np.testing.assert_allclose(np.asarray(out), np.asarray(ref_out), rtol=2e-2, atol=2e-2)
    np.testing.assert_allclose(np.asarray(attn), np.asarray(ref_attn), rtol=2e-2, atol=2e-2)

    print("KERNEL_OK")
</pallas_src>

<mosaic_0001>
module attributes {stable_mosaic.version = 11 : i64} {
  func.func @_encoder_layer_kernel(%arg0: i32, %arg1: memref<8x32xf32, #tpu.memory_space<vmem>>, %arg2: memref<32x96xbf16, #tpu.memory_space<vmem>>, %arg3: memref<1x96xf32, #tpu.memory_space<vmem>>, %arg4: memref<32x32xbf16, #tpu.memory_space<vmem>>, %arg5: memref<1x32xf32, #tpu.memory_space<vmem>>, %arg6: memref<1x32xf32, #tpu.memory_space<vmem>>, %arg7: memref<1x32xf32, #tpu.memory_space<vmem>>, %arg8: memref<32x64xbf16, #tpu.memory_space<vmem>>, %arg9: memref<1x64xf32, #tpu.memory_space<vmem>>, %arg10: memref<64x32xbf16, #tpu.memory_space<vmem>>, %arg11: memref<1x32xf32, #tpu.memory_space<vmem>>, %arg12: memref<1x32xf32, #tpu.memory_space<vmem>>, %arg13: memref<1x32xf32, #tpu.memory_space<vmem>>, %arg14: memref<8x32xf32, #tpu.memory_space<vmem>>, %arg15: memref<1x8x8xf32, #tpu.memory_space<vmem>>) attributes {dimension_semantics = [#tpu.dimension_semantics<parallel>], iteration_bounds = array<i64: 2>, scalar_prefetch = 0 : i64, scratch_operands = 0 : i64, tpu.core_type = #tpu.core_type<tc>, window_params = [{transform_indices = @transform_0, window_bounds = array<i64: 8, 32>}, {pipeline_mode = #tpu.pipeline_mode<synchronous>, transform_indices = @transform_1, window_bounds = array<i64: 32, 96>}, {pipeline_mode = #tpu.pipeline_mode<synchronous>, transform_indices = @transform_2, window_bounds = array<i64: 1, 96>}, {pipeline_mode = #tpu.pipeline_mode<synchronous>, transform_indices = @transform_3, window_bounds = array<i64: 32, 32>}, {pipeline_mode = #tpu.pipeline_mode<synchronous>, transform_indices = @transform_4, window_bounds = array<i64: 1, 32>}, {pipeline_mode = #tpu.pipeline_mode<synchronous>, transform_indices = @transform_5, window_bounds = array<i64: 1, 32>}, {pipeline_mode = #tpu.pipeline_mode<synchronous>, transform_indices = @transform_6, window_bounds = array<i64: 1, 32>}, {pipeline_mode = #tpu.pipeline_mode<synchronous>, transform_indices = @transform_7, window_bounds = array<i64: 32, 64>}, {pipeline_mode = #tpu.pipeline_mode<synchronous>, transform_indices = @transform_8, window_bounds = array<i64: 1, 64>}, {pipeline_mode = #tpu.pipeline_mode<synchronous>, transform_indices = @transform_9, window_bounds = array<i64: 64, 32>}, {pipeline_mode = #tpu.pipeline_mode<synchronous>, transform_indices = @transform_10, window_bounds = array<i64: 1, 32>}, {pipeline_mode = #tpu.pipeline_mode<synchronous>, transform_indices = @transform_11, window_bounds = array<i64: 1, 32>}, {pipeline_mode = #tpu.pipeline_mode<synchronous>, transform_indices = @transform_12, window_bounds = array<i64: 1, 32>}, {transform_indices = @transform_13, window_bounds = array<i64: 8, 32>}, {transform_indices = @transform_14, window_bounds = array<i64: 1, 8, 8>}]} {
    %c0 = arith.constant 0 : index
    %c0_0 = arith.constant 0 : index
    %0 = vector.load %arg1[%c0, %c0_0] : memref<8x32xf32, #tpu.memory_space<vmem>>, vector<8x32xf32>
    %1 = arith.truncf %0 : vector<8x32xf32> to vector<8x32xbf16>
    %c0_1 = arith.constant 0 : index
    %c0_2 = arith.constant 0 : index
    %2 = vector.load %arg2[%c0_1, %c0_2] : memref<32x96xbf16, #tpu.memory_space<vmem>>, vector<32x96xbf16>
    %cst = arith.constant dense<0.000000e+00> : vector<8x96xf32>
    %3 = tpu.matmul %1, %2, %cst {dimension_numbers = #tpu.dot_dimension_numbers<[1], [0], [0], [1], [0, 0, 1, 1], [], []>} : vector<8x32xbf16>, vector<32x96xbf16>, vector<8x96xf32> -> vector<8x96xf32>
    %c0_3 = arith.constant 0 : index
    %c0_4 = arith.constant 0 : index
    %4 = vector.load %arg3[%c0_3, %c0_4] : memref<1x96xf32, #tpu.memory_space<vmem>>, vector<1x96xf32>
    %5 = vector.broadcast %4 : vector<1x96xf32> to vector<8x96xf32>
    %6 = arith.addf %3, %5 : vector<8x96xf32>
    %7 = tpu.transpose %6, [1, 0] : vector<8x96xf32> -> vector<96x8xf32>
    %8 = vector.shape_cast %7 : vector<96x8xf32> to vector<12x8x8xf32>
    %9 = vector.extract_strided_slice %8 {offsets = [4, 0, 0], sizes = [4, 8, 8], strides = [1, 1, 1]} : vector<12x8x8xf32> to vector<4x8x8xf32>
    %10 = arith.truncf %9 : vector<4x8x8xf32> to vector<4x8x8xbf16>
    %11 = vector.extract_strided_slice %8 {offsets = [8, 0, 0], sizes = [4, 8, 8], strides = [1, 1, 1]} : vector<12x8x8xf32> to vector<4x8x8xf32>
    %12 = arith.truncf %11 : vector<4x8x8xf32> to vector<4x8x8xbf16>
    %13 = vector.extract_strided_slice %8 {offsets = [0, 0, 0], sizes = [4, 8, 8], strides = [1, 1, 1]} : vector<12x8x8xf32> to vector<4x8x8xf32>
    %14 = tpu.transpose %13, [0, 2, 1] : vector<4x8x8xf32> -> vector<4x8x8xf32>
    %15 = arith.truncf %14 : vector<4x8x8xf32> to vector<4x8x8xbf16>
    %cst_5 = arith.constant dense<0.000000e+00> : vector<4x8x8xf32>
    %16 = tpu.matmul %15, %10, %cst_5 {dimension_numbers = #tpu.dot_dimension_numbers<[2], [1], [1], [2], [0, 0, 0, 1, 1, 2], [0], [0]>} : vector<4x8x8xbf16>, vector<4x8x8xbf16>, vector<4x8x8xf32> -> vector<4x8x8xf32>
    %cst_6 = arith.constant dense<0xFF800000> : vector<4x8xf32>
    %17 = vector.multi_reduction <maximumf>, %16, %cst_6 [2] : vector<4x8x8xf32> to vector<4x8xf32>
    %18 = vector.shape_cast %17 : vector<4x8xf32> to vector<4x8x1xf32>
    %19 = vector.broadcast %18 : vector<4x8x1xf32> to vector<4x8x8xf32>
    %20 = arith.subf %16, %19 : vector<4x8x8xf32>
    %21 = math.exp %20 : vector<4x8x8xf32>
    %cst_7 = arith.constant dense<0.000000e+00> : vector<4x8xf32>
    %22 = vector.multi_reduction <add>, %21, %cst_7 [2] : vector<4x8x8xf32> to vector<4x8xf32>
    %23 = vector.shape_cast %22 : vector<4x8xf32> to vector<4x8x1xf32>
    %24 = tpu.reciprocal %23 {approx = true} : vector<4x8x1xf32> -> vector<4x8x1xf32>
    %25 = vector.broadcast %24 : vector<4x8x1xf32> to vector<4x8x8xf32>
    %26 = arith.mulf %21, %25 : vector<4x8x8xf32>
    %cst_8 = arith.constant dense<0.000000e+00> : vector<8x8xf32>
    %27 = vector.multi_reduction <add>, %26, %cst_8 [0] : vector<4x8x8xf32> to vector<8x8xf32>
    %cst_9 = arith.constant 4.000000e+00 : f32
    %28 = vector.broadcast %cst_9 : f32 to vector<8x8xf32>
    %29 = arith.divf %27, %28 : vector<8x8xf32>
    %c0_10 = arith.constant 0 : index
    %c0_11 = arith.constant 0 : index
    %c0_12 = arith.constant 0 : index
    %30 = vector.load %arg15[%c0_10, %c0_11, %c0_12] : memref<1x8x8xf32, #tpu.memory_space<vmem>>, vector<1x8x8xf32>
    %31 = vector.shape_cast %30 : vector<1x8x8xf32> to vector<8x8xf32>
    %32 = vector.shape_cast %29 : vector<8x8xf32> to vector<1x8x8xf32>
    tpu.vector_store %arg15[%c0_10, %c0_11, %c0_12], %32 {strides = array<i32>} : memref<1x8x8xf32, #tpu.memory_space<vmem>>, vector<1x8x8xf32>,
    %33 = arith.truncf %26 : vector<4x8x8xf32> to vector<4x8x8xbf16>
    %cst_13 = arith.constant dense<0.000000e+00> : vector<4x8x8xf32>
    %34 = tpu.matmul %12, %33, %cst_13 {dimension_numbers = #tpu.dot_dimension_numbers<[2], [2], [1], [1], [0, 0, 0, 1, 1, 1], [0], [0]>} : vector<4x8x8xbf16>, vector<4x8x8xbf16>, vector<4x8x8xf32> -> vector<4x8x8xf32>
    %35 = vector.shape_cast %34 : vector<4x8x8xf32> to vector<32x8xf32>
    %36 = tpu.transpose %35, [1, 0] : vector<32x8xf32> -> vector<8x32xf32>
    %37 = arith.truncf %36 : vector<8x32xf32> to vector<8x32xbf16>
    %c0_14 = arith.constant 0 : index
    %c0_15 = arith.constant 0 : index
    %38 = vector.load %arg4[%c0_14, %c0_15] : memref<32x32xbf16, #tpu.memory_space<vmem>>, vector<32x32xbf16>
    %cst_16 = arith.constant dense<0.000000e+00> : vector<8x32xf32>
    %39 = tpu.matmul %37, %38, %cst_16 {dimension_numbers = #tpu.dot_dimension_numbers<[1], [0], [0], [1], [0, 0, 1, 1], [], []>} : vector<8x32xbf16>, vector<32x32xbf16>, vector<8x32xf32> -> vector<8x32xf32>
    %c0_17 = arith.constant 0 : index
    %c0_18 = arith.constant 0 : index
    %40 = vector.load %arg5[%c0_17, %c0_18] : memref<1x32xf32, #tpu.memory_space<vmem>>, vector<1x32xf32>
    %41 = vector.broadcast %40 : vector<1x32xf32> to vector<8x32xf32>
    %42 = arith.addf %39, %41 : vector<8x32xf32>
    %43 = arith.addf %0, %42 : vector<8x32xf32>
    %c0_19 = arith.constant 0 : index
    %c0_20 = arith.constant 0 : index
    %44 = vector.load %arg6[%c0_19, %c0_20] : memref<1x32xf32, #tpu.memory_space<vmem>>, vector<1x32xf32>
    %c0_21 = arith.constant 0 : index
    %c0_22 = arith.constant 0 : index
    %45 = vector.load %arg7[%c0_21, %c0_22] : memref<1x32xf32, #tpu.memory_space<vmem>>, vector<1x32xf32>
    %cst_23 = arith.constant dense<0.000000e+00> : vector<8xf32>
    %46 = vector.multi_reduction <add>, %43, %cst_23 [1] : vector<8x32xf32> to vector<8xf32>
    %47 = vector.shape_cast %46 : vector<8xf32> to vector<8x1xf32>
    %cst_24 = arith.constant 3.200000e+01 : f32
    %48 = vector.broadcast %cst_24 : f32 to vector<8x1xf32>
    %49 = arith.divf %47, %48 : vector<8x1xf32>
    %50 = vector.broadcast %49 : vector<8x1xf32> to vector<8x32xf32>
    %51 = arith.subf %43, %50 : vector<8x32xf32>
    %52 = vector.broadcast %49 : vector<8x1xf32> to vector<8x32xf32>
    %53 = arith.subf %43, %52 : vector<8x32xf32>
    %54 = arith.mulf %51, %53 : vector<8x32xf32>
    %cst_25 = arith.constant dense<0.000000e+00> : vector<8xf32>
    %55 = vector.multi_reduction <add>, %54, %cst_25 [1] : vector<8x32xf32> to vector<8xf32>
    %56 = vector.shape_cast %55 : vector<8xf32> to vector<8x1xf32>
    %cst_26 = arith.constant 3.200000e+01 : f32
    %57 = vector.broadcast %cst_26 : f32 to vector<8x1xf32>
    %58 = arith.divf %56, %57 : vector<8x1xf32>
    %59 = vector.broadcast %49 : vector<8x1xf32> to vector<8x32xf32>
    %60 = arith.subf %43, %59 : vector<8x32xf32>
    %cst_27 = arith.constant 9.99999974E-6 : f32
    %61 = vector.broadcast %cst_27 : f32 to vector<8x1xf32>
    %62 = arith.addf %58, %61 : vector<8x1xf32>
    %63 = math.rsqrt %62 : vector<8x1xf32>
    %64 = vector.broadcast %63 : vector<8x1xf32> to vector<8x32xf32>
    %65 = arith.mulf %60, %64 : vector<8x32xf32>
    %66 = vector.broadcast %44 : vector<1x32xf32> to vector<8x32xf32>
    %67 = arith.mulf %65, %66 : vector<8x32xf32>
    %68 = vector.broadcast %45 : vector<1x32xf32> to vector<8x32xf32>
    %69 = arith.addf %67, %68 : vector<8x32xf32>
    %70 = arith.truncf %69 : vector<8x32xf32> to vector<8x32xbf16>
    %c0_28 = arith.constant 0 : index
    %c0_29 = arith.constant 0 : index
    %71 = vector.load %arg8[%c0_28, %c0_29] : memref<32x64xbf16, #tpu.memory_space<vmem>>, vector<32x64xbf16>
    %cst_30 = arith.constant dense<0.000000e+00> : vector<8x64xf32>
    %72 = tpu.matmul %70, %71, %cst_30 {dimension_numbers = #tpu.dot_dimension_numbers<[1], [0], [0], [1], [0, 0, 1, 1], [], []>} : vector<8x32xbf16>, vector<32x64xbf16>, vector<8x64xf32> -> vector<8x64xf32>
    %c0_31 = arith.constant 0 : index
    %c0_32 = arith.constant 0 : index
    %73 = vector.load %arg9[%c0_31, %c0_32] : memref<1x64xf32, #tpu.memory_space<vmem>>, vector<1x64xf32>
    %74 = vector.broadcast %73 : vector<1x64xf32> to vector<8x64xf32>
    %75 = arith.addf %72, %74 : vector<8x64xf32>
    %cst_33 = arith.constant 0.000000e+00 : f32
    %76 = vector.broadcast %cst_33 : f32 to vector<8x64xf32>
    %77 = arith.maximumf %75, %76 : vector<8x64xf32>
    %78 = arith.truncf %77 : vector<8x64xf32> to vector<8x64xbf16>
    %c0_34 = arith.constant 0 : index
    %c0_35 = arith.constant 0 : index
    %79 = vector.load %arg10[%c0_34, %c0_35] : memref<64x32xbf16, #tpu.memory_space<vmem>>, vector<64x32xbf16>
    %cst_36 = arith.constant dense<0.000000e+00> : vector<8x32xf32>
    %80 = tpu.matmul %78, %79, %cst_36 {dimension_numbers = #tpu.dot_dimension_numbers<[1], [0], [0], [1], [0, 0, 1, 1], [], []>} : vector<8x64xbf16>, vector<64x32xbf16>, vector<8x32xf32> -> vector<8x32xf32>
    %c0_37 = arith.constant 0 : index
    %c0_38 = arith.constant 0 : index
    %81 = vector.load %arg11[%c0_37, %c0_38] : memref<1x32xf32, #tpu.memory_space<vmem>>, vector<1x32xf32>
    %82 = vector.broadcast %81 : vector<1x32xf32> to vector<8x32xf32>
    %83 = arith.addf %80, %82 : vector<8x32xf32>
    %84 = arith.addf %69, %83 : vector<8x32xf32>
    %c0_39 = arith.constant 0 : index
    %c0_40 = arith.constant 0 : index
    %85 = vector.load %arg12[%c0_39, %c0_40] : memref<1x32xf32, #tpu.memory_space<vmem>>, vector<1x32xf32>
    %c0_41 = arith.constant 0 : index
    %c0_42 = arith.constant 0 : index
    %86 = vector.load %arg13[%c0_41, %c0_42] : memref<1x32xf32, #tpu.memory_space<vmem>>, vector<1x32xf32>
    %cst_43 = arith.constant dense<0.000000e+00> : vector<8xf32>
    %87 = vector.multi_reduction <add>, %84, %cst_43 [1] : vector<8x32xf32> to vector<8xf32>
    %88 = vector.shape_cast %87 : vector<8xf32> to vector<8x1xf32>
    %cst_44 = arith.constant 3.200000e+01 : f32
    %89 = vector.broadcast %cst_44 : f32 to vector<8x1xf32>
    %90 = arith.divf %88, %89 : vector<8x1xf32>
    %91 = vector.broadcast %90 : vector<8x1xf32> to vector<8x32xf32>
    %92 = arith.subf %84, %91 : vector<8x32xf32>
    %93 = vector.broadcast %90 : vector<8x1xf32> to vector<8x32xf32>
    %94 = arith.subf %84, %93 : vector<8x32xf32>
    %95 = arith.mulf %92, %94 : vector<8x32xf32>
    %cst_45 = arith.constant dense<0.000000e+00> : vector<8xf32>
    %96 = vector.multi_reduction <add>, %95, %cst_45 [1] : vector<8x32xf32> to vector<8xf32>
    %97 = vector.shape_cast %96 : vector<8xf32> to vector<8x1xf32>
    %cst_46 = arith.constant 3.200000e+01 : f32
    %98 = vector.broadcast %cst_46 : f32 to vector<8x1xf32>
    %99 = arith.divf %97, %98 : vector<8x1xf32>
    %100 = vector.broadcast %90 : vector<8x1xf32> to vector<8x32xf32>
    %101 = arith.subf %84, %100 : vector<8x32xf32>
    %cst_47 = arith.constant 9.99999974E-6 : f32
    %102 = vector.broadcast %cst_47 : f32 to vector<8x1xf32>
    %103 = arith.addf %99, %102 : vector<8x1xf32>
    %104 = math.rsqrt %103 : vector<8x1xf32>
    %105 = vector.broadcast %104 : vector<8x1xf32> to vector<8x32xf32>
    %106 = arith.mulf %101, %105 : vector<8x32xf32>
    %107 = vector.broadcast %85 : vector<1x32xf32> to vector<8x32xf32>
    %108 = arith.mulf %106, %107 : vector<8x32xf32>
    %109 = vector.broadcast %86 : vector<1x32xf32> to vector<8x32xf32>
    %110 = arith.addf %108, %109 : vector<8x32xf32>
    %c0_48 = arith.constant 0 : index
    %c0_49 = arith.constant 0 : index
    %111 = vector.load %arg14[%c0_48, %c0_49] : memref<8x32xf32, #tpu.memory_space<vmem>>, vector<8x32xf32>
    tpu.vector_store %arg14[%c0_48, %c0_49], %110 {strides = array<i32>} : memref<8x32xf32, #tpu.memory_space<vmem>>, vector<8x32xf32>,
    return
  }
  func.func @transform_0(%arg0: i32) -> (i32, i32) {
    %c0_i32 = arith.constant 0 : i32
    %c0_i32_0 = arith.constant 0 : i32
    return %arg0, %c0_i32 : i32, i32
  }
  func.func @transform_1(%arg0: i32) -> (i32, i32) {
    %c0_i32 = arith.constant 0 : i32
    %c0_i32_0 = arith.constant 0 : i32
    %c0_i32_1 = arith.constant 0 : i32
    return %c0_i32, %c0_i32_0 : i32, i32
  }
  func.func @transform_2(%arg0: i32) -> (i32, i32) {
    %c0_i32 = arith.constant 0 : i32
    %c0_i32_0 = arith.constant 0 : i32
    %c0_i32_1 = arith.constant 0 : i32
    return %c0_i32, %c0_i32_0 : i32, i32
  }
  func.func @transform_3(%arg0: i32) -> (i32, i32) {
    %c0_i32 = arith.constant 0 : i32
    %c0_i32_0 = arith.constant 0 : i32
    %c0_i32_1 = arith.constant 0 : i32
    return %c0_i32, %c0_i32_0 : i32, i32
  }
  func.func @transform_4(%arg0: i32) -> (i32, i32) {
    %c0_i32 = arith.constant 0 : i32
    %c0_i32_0 = arith.constant 0 : i32
    %c0_i32_1 = arith.constant 0 : i32
    return %c0_i32, %c0_i32_0 : i32, i32
  }
  func.func @transform_5(%arg0: i32) -> (i32, i32) {
    %c0_i32 = arith.constant 0 : i32
    %c0_i32_0 = arith.constant 0 : i32
    %c0_i32_1 = arith.constant 0 : i32
    return %c0_i32, %c0_i32_0 : i32, i32
  }
  func.func @transform_6(%arg0: i32) -> (i32, i32) {
    %c0_i32 = arith.constant 0 : i32
    %c0_i32_0 = arith.constant 0 : i32
    %c0_i32_1 = arith.constant 0 : i32
    return %c0_i32, %c0_i32_0 : i32, i32
  }
  func.func @transform_7(%arg0: i32) -> (i32, i32) {
    %c0_i32 = arith.constant 0 : i32
    %c0_i32_0 = arith.constant 0 : i32
    %c0_i32_1 = arith.constant 0 : i32
    return %c0_i32, %c0_i32_0 : i32, i32
  }
  func.func @transform_8(%arg0: i32) -> (i32, i32) {
    %c0_i32 = arith.constant 0 : i32
    %c0_i32_0 = arith.constant 0 : i32
    %c0_i32_1 = arith.constant 0 : i32
    return %c0_i32, %c0_i32_0 : i32, i32
  }
  func.func @transform_9(%arg0: i32) -> (i32, i32) {
    %c0_i32 = arith.constant 0 : i32
    %c0_i32_0 = arith.constant 0 : i32
    %c0_i32_1 = arith.constant 0 : i32
    return %c0_i32, %c0_i32_0 : i32, i32
  }
  func.func @transform_10(%arg0: i32) -> (i32, i32) {
    %c0_i32 = arith.constant 0 : i32
    %c0_i32_0 = arith.constant 0 : i32
    %c0_i32_1 = arith.constant 0 : i32
    return %c0_i32, %c0_i32_0 : i32, i32
  }
  func.func @transform_11(%arg0: i32) -> (i32, i32) {
    %c0_i32 = arith.constant 0 : i32
    %c0_i32_0 = arith.constant 0 : i32
    %c0_i32_1 = arith.constant 0 : i32
    return %c0_i32, %c0_i32_0 : i32, i32
  }
  func.func @transform_12(%arg0: i32) -> (i32, i32) {
    %c0_i32 = arith.constant 0 : i32
    %c0_i32_0 = arith.constant 0 : i32
    %c0_i32_1 = arith.constant 0 : i32
    return %c0_i32, %c0_i32_0 : i32, i32
  }
  func.func @transform_13(%arg0: i32) -> (i32, i32) {
    %c0_i32 = arith.constant 0 : i32
    %c0_i32_0 = arith.constant 0 : i32
    return %arg0, %c0_i32 : i32, i32
  }
  func.func @transform_14(%arg0: i32) -> (i32, i32, i32) {
    %c0_i32 = arith.constant 0 : i32
    %c0_i32_0 = arith.constant 0 : i32
    %c0_i32_1 = arith.constant 0 : i32
    return %arg0, %c0_i32, %c0_i32_0 : i32, i32, i32
  }
}

</mosaic_0001>

<bundles_post_ra>
// kernel: transformer_sentence_encoder_layer.1
= control target key start
LH: loop header
LB: loop body
LE: loop exit
PB: predicated region body
PF: predicated region fallthrough
CT: control target
= control target key end

     0   :  { %s2198_s0 = inlined_call_operand.vmem [shape: f32[16,32], index: 0, kind: input, shape index: {}]   ;;  %s2199_s1 = inlined_call_operand.vmem [shape: bf16[32,96], index: 1, kind: input, shape index: {}]   ;;  %s2200_s2 = inlined_call_operand.vmem [shape: f32[1,96], index: 2, kind: input, shape index: {}]   ;;  %s2201_s3 = inlined_call_operand.vmem [shape: bf16[32,32], index: 3, kind: input, shape index: {}]   ;;  %s2202_s4 = inlined_call_operand.vmem [shape: f32[1,32], index: 4, kind: input, shape index: {}]   ;;  %s2203_s5 = inlined_call_operand.vmem [shape: f32[1,32], index: 5, kind: input, shape index: {}]   ;;  %s2204_s6 = inlined_call_operand.vmem [shape: f32[1,32], index: 6, kind: input, shape index: {}]   ;;  %s2205_s7 = inlined_call_operand.vmem [shape: bf16[32,64], index: 7, kind: input, shape index: {}]   ;;  %s2206_s8 = inlined_call_operand.vmem [shape: f32[1,64], index: 8, kind: input, shape index: {}]   ;;  %s2207_s9 = inlined_call_operand.vmem [shape: bf16[64,32], index: 9, kind: input, shape index: {}]   ;;  %s2208_s10 = inlined_call_operand.vmem [shape: f32[1,32], index: 10, kind: input, shape index: {}]   ;;  %s2209_s11 = inlined_call_operand.vmem [shape: f32[1,32], index: 11, kind: input, shape index: {}]   ;;  %s2210_s12 = inlined_call_operand.vmem [shape: f32[1,32], index: 12, kind: input, shape index: {}]   ;;  %s2211_s13 = inlined_call_operand.vmem [shape: f32[16,32], index: 13, kind: output, shape index: {0}]   ;;  %s2212_s14 = inlined_call_operand.hbm [shape: f32[2,8,8], index: 14, kind: output, shape index: {1}]  }
   0x1   :  { %2216 = sst [smem:[#allocation5_spill]] %s2198_s0 }
   0x2   :  { %2217 = sst [smem:[#allocation6_spill]] %s2199_s1 }
   0x3   :  { %2218 = sst [smem:[#allocation7_spill]] %s2200_s2 }
   0x4   :  { %2219 = sst [smem:[#allocation8_spill]] %s2201_s3 }
   0x5   :  { %2220 = sst [smem:[#allocation9_spill]] %s2202_s4 }
   0x6   :  { %2221 = sst [smem:[#allocation10_spill]] %s2203_s5 }
   0x7   :  { %2222 = sst [smem:[#allocation11_spill]] %s2204_s6 }
   0x8   :  { %20 = vsyncpa [#allocation3], 0 }
   0x9   :  { %22 = vsyncpa [#allocation3 + $0x1], 0  ;;  %s1929_s29 = smov 0   ;;  %s1931_s30 = smov 0  }
   0xa   :  { %s1933_s15 = smov 0   ;;  %s1935_s16 = smov 0  }
   0xb LB: > { %s1950_s17 = sadd.s32 4294967295, %s1849_s16   ;;  %s1561_s18 = sadd.s32 4294967294, %s1849_s16   ;;  %s1849_s16 = sphi %s1935_s16, %s2238_s16   ;;  %s1845_s15 = sphi %s1933_s15, %s2237_s15   ;;  %s1841_s30 = sphi %s1931_s30, %s2236_s30   ;;  %s1837_s29 = sphi %s1929_s29, %s2235_s29  }
   0xc   : > { %s1954_s19 = sadd.s32 1, %s1849_s16   ;;  %s339_s20 = sadd.s32 1, %s1845_s15 }
   0xd   : > { %s336_s21 = ssub.s32 %s1849_s16, %s1954_s19  ;;  %p349_p0 = scmp.ne.s32.totalorder %s1845_s15, %s1841_s30 }
   0xe   : > { %p337_p1 = scmp.eq.s32.totalorder %s336_s21, 0  ;;  %p350_p2 = scmp.eq.s32.totalorder %s1950_s17, 1 }
   0xf   : > { %p355_p3 = scmp.ne.s32.totalorder %s1841_s30, %s1837_s29  ;;  %p356_p4 = scmp.eq.s32.totalorder %s1561_s18, 1 }
  0x10   : > { %s1965_s22 = scalar_select %p337_p1, %s1845_s15, %s339_s20  }
  0x11   : > { %p1967_p5 = por %p350_p2, %p349_p0  ;;  %p1971_p6 = por %p356_p4, %p355_p3 }
  0x12   : > { %p1564_p7 = scmp.ge.s32.totalorder %s1849_s16, 1  ;;  %p417_p8 = scmp.lt.s32.totalorder %s1849_s16, 3 }
  0x14   : > { %p418_p9 = pnand %p1564_p7, %p417_p8 }
  0x15   : > { %s2225_s1 = sld [smem:[#allocation6_spill]] (!%p418_p9)  ;;  %v1851_v1 = vmov (!%p418_p9), 0.0   ;;  %vm1852_vm0 = vmmov (!%p418_p9), 0   ;;  %p466_p10 = scmp.lt.s32.totalorder (!%p418_p9), %s1950_s17, 1  ;;  %vm500_vm1 = vcmask (!%p418_p9), 261120   ;;  %vm720_vm2 = vcmask (!%p418_p9), 1043456  }
  0x16   : > { %421 = sbr.rel (%p418_p9) target bundleno = 2680 (0xa78), region = 72  ;;  %1632 = vmatprep.subr.bf16.mxu0 (!%p418_p9), %v1851_v1  ;;  %1640 = vmatprep.subr.bf16.mxu1 (!%p418_p9), %v1851_v1  ;;  %s2226_s0 = sld [smem:[#allocation5_spill]] (!%p418_p9)  ;;  %vm716_vm3 = vcmask (!%p418_p9), 64512   ;;  %vm1382_vm4 = vcmask (!%p418_p9), 523264  }
  0x17   : > { %1636 = vmatprep.mubr.msk.bf16.mxu0 (!%p418_p9), %vm1852_vm0, %v1851_v1  ;;  %1642 = vmatprep.mubr.msk.bf16.mxu1 (!%p418_p9), %vm1852_vm0, %v1851_v1  ;;  %s2227_s2 = sld [smem:[#allocation7_spill]] (!%p418_p9)  ;;  %s2214_s21 = sand.u32 (!%p418_p9), 1, %s1841_s30  }
  0x18   : > { %s2069_s25 = sshll.u32 (!%p418_p9), %s2214_s21, 3  ;;  %s2228_s3 = sld [smem:[#allocation8_spill]] (!%p418_p9) }
  0x19   : > { %s2229_s4 = sld [smem:[#allocation9_spill]] (!%p418_p9)  ;;  %s2230_s5 = sld [smem:[#allocation10_spill]] (!%p418_p9) }
  0x1a   : > { %s2231_s6 = sld [smem:[#allocation11_spill]] (!%p418_p9) }
  0x1b   : > { %v1757_v0 = vld [vmem:[%s2225_s1] sm:$0xff] (!%p418_p9)   ;;  %v1758_v2 = vld [vmem:[%s2225_s1 + $0x8] sm:$0xff] (!%p418_p9)   ;;  %s1599_s1 = sshll.u32 (!%p418_p9), %s1950_s17, 7 }
  0x1c   : > { %1633 = vmatpush3.bf16.msra.mxu0 (!%p418_p9), %v1757_v0  ;;  %s2148_s28 = scalar_lea.hbm (!%p418_p9), %s2212_s14, %s1599_s1 }
  0x1d   : > { %1634 = vmatprep.subr.bf16.mxu0 %v1851_v1  ;;  %s1992_s18 = scalar_select %p466_p10, %s1950_s17, 1  ;;  %v1568_v5 = vld [vmem:[%s2227_s2] ss:$0 sm:$0xff] }
  0x1e   : > { %s2232_s2 = scalar_lea.vmem [#allocation2], %s2069_s25 }
  0x1f   : > { %s2213_s20 = sshll.u32 %s1992_s18, 3 }
  0x20   : > { %1635 = vmatpush3.bf16.msra.mxu0 %v1758_v2  ;;  %s469_s26 = scalar_lea.vmem %s2226_s0, %s2213_s20  ;;  %s1478_s20 = sshll.u32 %s2232_s2, 4  ;;  %s1479_s20 = int_to_ptr.vmem [resolvable:$true] %s1478_s20 }
  0x21   : > { %1664 = vmatprep.subr.bf16.mxu0 %v1851_v1  ;;  %v2001_v3 = vld [vmem:[%s469_s26] sm:$0xff]  ;;  %s2215_s26 = scalar_lea.vmem [#allocation2], %s2069_s25  ;;  %s2233_s0 = sand.u32 1, %s1841_s30  }
  0x22   : > { %v476_v4 = vpack.c.bf16 %v2001_v3, %v2001_v3 }
  0x24   : > { %1637 = vmatmul.mubr.msk.bf16.vlgmr.msra.gmra.mrb[0].mxu0 %vm500_vm1, %v476_v4 }
  0x25   : > { %1666 = vmatprep.mubr.msk.bf16.mxu0 %vm1852_vm0, %v1851_v1 }
  0xf7   : > { %v538_v6 = vpop.f32.mrb[0].mxu0 }
  0xf8   : > { %v1638_v7 = vpop.f32.mrb[1].mxu0  ;;  %v539_v8 = vadd.f32 %v1568_v5, %v538_v6 }
  0xf9   : > { %v541_v9 = vpop.f32.mrb[2].mxu0 }
  0xfa   : > { %544 = vxpose.xlu0.b32.start.end [1/1] (short) (narrow) %v539_v8, 96  ;;  %v1639_v10 = vpop.f32.mrb[3].mxu0 }
 0x17a   : > { %v560_v11 = vpop.trf.xlu0 }
 0x17b   : > { %584 = vxpose.xlu0.b32.start.end [1/1] (short) (narrow) %v560_v11, 8 }
 0x17e   : > { %v561_v12 = vpop.trf.xlu0 }
 0x17f   : > { %616 = vxpose.xlu1.b32.start.end [1/1] (short) (narrow) %v561_v12, 8 }
 0x182   : > { %v562_v13 = vpop.trf.xlu0 }
 0x183   : > { %648 = vxpose.xlu1.b32.start.end [1/1] (short) (narrow) %v562_v13, 8 }
 0x186   : > { %v563_v14 = vpop.trf.xlu0 }
 0x187   : > { %680 = vxpose.xlu1.b32.start.end [1/1] (short) (narrow) %v563_v14, 8 }
 0x18a   : > { %v564_v15 = vpop.trf.xlu0 }
 0x18b   : > { %v576_v16 = vpack.c.bf16 %v564_v15, %v564_v15 }
 0x18d   : > { %v722_v17 = vsel %vm720_vm2, %v576_v16, 0 }
 0x18e   : > { %1641 = vmatpush3.bf16.msra.mxu1 %v722_v17  ;;  %v565_v18 = vpop.trf.xlu0 }
 0x18f   : > { %1646 = vmatprep.subr.bf16.mxu1 %v1851_v1  ;;  %v577_v25 = vpack.c.bf16 %v565_v18, %v565_v18 }
 0x191   : > { %v768_v28 = vsel %vm720_vm2, %v577_v25, 0 }
 0x192   : > { %v566_v19 = vpop.trf.xlu0 }
 0x193   : > { %v578_v30 = vpack.c.bf16 %v566_v19, %v566_v19 }
 0x195   : > { %v814_v32 = vsel %vm720_vm2, %v578_v30, 0 }
 0x196   : > { %v567_v20 = vpop.trf.xlu0 }
 0x197   : > { %v579_v34 = vpack.c.bf16 %v567_v20, %v567_v20 }
 0x199   : > { %v860_v36 = vsel %vm720_vm2, %v579_v34, 0 }
 0x19a   : > { %v2013_v21 = vpop.trf.xlu0 }
 0x19b   : > { %v580_v30 = vpack.c.bf16 %v2013_v21, %v2013_v21 }
 0x19e   : > { %v2015_v22 = vpop.trf.xlu0 }
 0x19f   : > { %v581_v21 = vpack.c.bf16 %v2015_v22, %v2015_v22 }
 0x1a2   : > { %v2017_v23 = vpop.trf.xlu0 }
 0x1a6   : > { %v2019_v24 = vpop.trf.xlu0 }
 0x1fb   : > { %v600_v26 = vpop.trf.xlu0 }
 0x1fc   : > { %v712_v27 = vpack.c.bf16 %v600_v26, %v600_v26 }
 0x1fe   : > { %1643 = vmatmul.mubr.msk.bf16.vlgmr.msra.gmra.mrb[0].mxu1 %vm716_vm3, %v712_v27 }
 0x1ff   : > { %1647 = vmatpush3.bf16.msra.mxu1 %v768_v28  ;;  %v632_v29 = vpop.trf.xlu1  ;;  %1648 = vmatprep.mubr.msk.bf16.mxu1 %vm1852_vm0, %v1851_v1 }
 0x200   : > { %1652 = vmatprep.subr.bf16.mxu1 %v1851_v1  ;;  %v713_v31 = vpack.c.bf16 %v632_v29, %v632_v29 }
 0x203   : > { %v664_v33 = vpop.trf.xlu1 }
 0x204   : > { %v714_v35 = vpack.c.bf16 %v664_v33, %v664_v33 }
 0x206   : > { %1649 = vmatmul.mubr.msk.bf16.vlgmr.msra.gmra.mrb[4].mxu1 %vm716_vm3, %v713_v31 }
 0x207   : > { %1653 = vmatpush3.bf16.msra.mxu1 %v814_v32  ;;  %1654 = vmatprep.mubr.msk.bf16.mxu1 %vm1852_vm0, %v1851_v1  ;;  %v696_v37 = vpop.trf.xlu1 }
 0x208   : > { %1658 = vmatprep.subr.bf16.mxu1 %v1851_v1  ;;  %v715_v38 = vpack.c.bf16 %v696_v37, %v696_v37 }
 0x20e   : > { %1655 = vmatmul.mubr.msk.bf16.vlgmr.msra.gmra.mrb[8].mxu1 %vm716_vm3, %v714_v35 }
 0x20f   : > { %1659 = vmatpush3.bf16.msra.mxu1 %v860_v36  ;;  %1660 = vmatprep.mubr.msk.bf16.mxu1 %vm1852_vm0, %v1851_v1 }
 0x210   : > { %1670 = vmatprep.subr.bf16.mxu1 %v1851_v1 }
 0x216   : > { %1661 = vmatmul.mubr.msk.bf16.vlgmr.msra.gmra.mrb[12].mxu1 %vm716_vm3, %v715_v38 }
 0x217   : > { %1672 = vmatprep.mubr.msk.bf16.mxu1 %vm1852_vm0, %v1851_v1 }
 0x2d1   : > { %v758_v39 = vpop.f32.mrb[0].mxu1 }
 0x2d2   : > { %v1644_v40 = vpop.f32.mrb[1].mxu1  ;;  %v902_v41 = vsel %vm716_vm3, %v758_v39, -inf }
 0x2d3   : > { %903 = vmax.xlane.f32.xlu1 %v902_v41  ;;  %v761_v42 = vpop.f32.mrb[2].mxu1 }
 0x2d4   : > { %v1645_v43 = vpop.f32.mrb[3].mxu1 }
 0x2d9   : > { %v804_v44 = vpop.f32.mrb[4].mxu1 }
 0x2da   : > { %v1650_v45 = vpop.f32.mrb[5].mxu1  ;;  %v905_v46 = vsel %vm716_vm3, %v804_v44, -inf }
 0x2db   : > { %906 = vmax.xlane.f32.xlu0 %v905_v46  ;;  %v807_v47 = vpop.f32.mrb[6].mxu1 }
 0x2dc   : > { %v1651_v48 = vpop.f32.mrb[7].mxu1 }
 0x2e1   : > { %v850_v49 = vpop.f32.mrb[8].mxu1 }
 0x2e2   : > { %v1656_v50 = vpop.f32.mrb[9].mxu1  ;;  %v908_v51 = vsel %vm716_vm3, %v850_v49, -inf }
 0x2e3   : > { %909 = vmax.xlane.f32.xlu1 %v908_v51  ;;  %v853_v52 = vpop.f32.mrb[10].mxu1  ;;  %v1759_v50 = vld [vmem:[%s2228_s3] sm:$0xff]   ;;  %v1760_v51 = vld [vmem:[%s2228_s3 + $0x8] sm:$0xff]   ;;  %s1787_s3 = scalar_lea.vmem %s1479_s20, 128 }
 0x2e4   : > { %v1657_v53 = vpop.f32.mrb[11].mxu1  ;;  %p1788_p11 = scmp.ne.s32.totalorder %s1479_s20, %s1787_s3 }
 0x2e6   : > { %p1789_p12 = pnand %p1788_p11, %p1967_p5 }
 0x2e8   : > { %p1790_p13 = pneg %p1789_p12 }
 0x2e9   : > { %v896_v54 = vpop.f32.mrb[12].mxu1 }
 0x2ea   : > { %v1662_v55 = vpop.f32.mrb[13].mxu1  ;;  %v911_v56 = vsel %vm716_vm3, %v896_v54, -inf }
 0x2eb   : > { %912 = vmax.xlane.f32.xlu1 %v911_v56  ;;  %v899_v57 = vpop.f32.mrb[14].mxu1 }
 0x2ec   : > { %v1663_v58 = vpop.f32.mrb[15].mxu1 }
 0x360   : > { %v904_v59 = vpop.xlane.xlu1 %903 }
 0x361   : > { %v914_v60 = vsub.f32 %v758_v39, %v904_v59 }
 0x363   : > { %v918_v61 = vmul.f32 1.442695, %v914_v60 }
 0x365   : > { %1767 = vpow2.f32 %v918_v61 }
 0x368   : > { %v907_v62 = vpop.xlane.xlu0 %906 }
 0x369   : > { %v915_v63 = vsub.f32 %v804_v44, %v907_v62  ;;  %v582_v44 = vpack.c.bf16 %v2017_v23, %v2017_v23  ;;  %v583_v23 = vpack.c.bf16 %v2019_v24, %v2019_v24 }
 0x36b   : > { %v920_v0 = vmul.f32 1.442695, %v915_v63 }
 0x36d   : > { %1769 = vpow2.f32 %v920_v0 }
 0x36f   : > { %v1768_v2 = vpop.eup %1767 }
 0x370   : > { %v910_v4 = vpop.xlane.xlu1 %909  ;;  %v926_v5 = vsel %vm716_vm3, %v1768_v2, 0.0 }
 0x371   : > { %v916_v6 = vsub.f32 %v850_v49, %v910_v4  ;;  %927 = vadd.xlane.f32.xlu1 %v926_v5 }
 0x373   : > { %v922_v7 = vmul.f32 1.442695, %v916_v6 }
 0x375   : > { %1771 = vpow2.f32 %v922_v7  ;;  %v1580_v7 = vld [vmem:[%s2229_s4] ss:$0 sm:$0xff]  ;;  %s1853_s4 = smov [#allocation2]  }
 0x377   : > { %v1770_v8 = vpop.eup %1769 }
 0x378   : > { %v913_v9 = vpop.xlane.xlu1 %912  ;;  %v929_v10 = vsel %vm716_vm3, %v1770_v8, 0.0 }
 0x379   : > { %v917_v11 = vsub.f32 %v896_v54, %v913_v9  ;;  %930 = vadd.xlane.f32.xlu1 %v929_v10 }
 0x37b   : > { %v924_v12 = vmul.f32 1.442695, %v917_v11 }
 0x37d   : > { %1773 = vpow2.f32 %v924_v12 }
 0x37f   : > { %v1772_v13 = vpop.eup %1771 }
 0x380   : > { %v932_v14 = vsel %vm716_vm3, %v1772_v13, 0.0 }
 0x381   : > { %933 = vadd.xlane.f32.xlu1 %v932_v14 }
 0x387   : > { %v1774_v15 = vpop.eup %1773 }
 0x388   : > { %v935_v16 = vsel %vm716_vm3, %v1774_v15, 0.0 }
 0x389   : > { %936 = vadd.xlane.f32.xlu1 %v935_v16 }
 0x3fe   : > { %v928_v17 = vpop.xlane.xlu1 %927 }
 0x3ff   : > { %1775 = vrcp.f32 %v928_v17 }
 0x406   : > { %v931_v18 = vpop.xlane.xlu1 %930 }
 0x407   : > { %1777 = vrcp.f32 %v931_v18 }
 0x409   : > { %v1776_v19 = vpop.eup %1775 }
 0x40a   : > { %v942_v20 = vmul.f32 %v1776_v19, %v1768_v2 }
 0x40c   : > { %v956_v25 = vpack.c.bf16 %v942_v20, %v942_v20  ;;  %v946_v39 = vsel %vm716_vm3, %v942_v20, 0.0  ;;  %v1761_v20 = vld [vmem:[%s2205_s7] sm:$0xff]  }
 0x40e   : > { %v934_v26 = vpop.xlane.xlu1 %933  ;;  %v964_v27 = vsel %vm716_vm3, %v956_v25, 0  ;;  %v1762_v25 = vld [vmem:[%s2205_s7 + $0x8] sm:$0xff]  }
 0x40f   : > { %1779 = vrcp.f32 %v934_v26  ;;  %1665 = vmatpush3.bf16.xpose.msra.mxu0 %v964_v27  ;;  %v1764_v26 = vld [vmem:[%s2207_s9 + $0x8] sm:$0xff]  }
 0x410   : > { %1676 = vmatprep.subr.bf16.mxu0 %v1851_v1 }
 0x411   : > { %v1778_v28 = vpop.eup %1777 }
 0x412   : > { %v943_v29 = vmul.f32 %v1778_v28, %v1770_v8 }
 0x414   : > { %v957_v31 = vpack.c.bf16 %v943_v29, %v943_v29  ;;  %v947_v37 = vsel %vm716_vm3, %v943_v29, 0.0 }
 0x415   : > { %v948_v22 = vadd.f32 %v947_v37, %v946_v39  ;;  %v1766_v37 = vld [vmem:[%s2207_s9 + $0x18] sm:$0xff]  }
 0x416   : > { %1667 = vmatmul.mubr.msk.bf16.vlgmr.msra.gmra.mrb[4].mxu0 %vm716_vm3, %v580_v30  ;;  %v937_v32 = vpop.xlane.xlu1 %936  ;;  %v1010_v33 = vsel %vm716_vm3, %v957_v31, 0  ;;  %v1584_v31 = vld [vmem:[%s2230_s5] ss:$0 sm:$0xff]  ;;  %s1791_s5 = sshll.u32 %s1853_s4, 4  ;;  %s1792_s5 = int_to_ptr.vmem [resolvable:$false] %s1791_s5 }
 0x417   : > { %1781 = vrcp.f32 %v937_v32  ;;  %1671 = vmatpush3.bf16.xpose.msra.mxu1 %v1010_v33  ;;  %1678 = vmatprep.mubr.msk.bf16.mxu0 %vm1852_vm0, %v1851_v1  ;;  %v1585_v33 = vld [vmem:[%s2231_s6] ss:$0 sm:$0xff]  ;;  %s1793_s6 = scalar_lea.vmem %s1792_s5, 256  ;;  %p1794_p0 = scmp.lt.s32.totalorder %s1479_s20, %s1792_s5 }
 0x418   : > { %1682 = vmatprep.subr.bf16.mxu1 %v1851_v1  ;;  %p1795_p1 = scmp.lt.s32.totalorder %s1793_s6, %s1787_s3 }
 0x419   : > { %v1780_v34 = vpop.eup %1779 }
 0x41a   : > { %v944_v35 = vmul.f32 %v1780_v34, %v1772_v13  ;;  %p1796_p2 = por %p1795_p1, %p1794_p0 }
 0x41c   : > { %v958_v36 = vpack.c.bf16 %v944_v35, %v944_v35  ;;  %v949_v40 = vsel %vm716_vm3, %v944_v35, 0.0  ;;  %p1797_p3 = pnand %p1796_p2, %p1790_p13 }
 0x41d   : > { %v950_v43 = vadd.f32 %v949_v40, %v948_v22 }
 0x41e   : > { %1673 = vmatmul.mubr.msk.bf16.vlgmr.msra.gmra.mrb[16].mxu1 %vm716_vm3, %v581_v21  ;;  %v1056_v38 = vsel %vm716_vm3, %v958_v36, 0  ;;  %v1765_v36 = vld [vmem:[%s2207_s9 + $0x10] sm:$0xff]  }
 0x41f   : > { %1677 = vmatpush3.bf16.xpose.msra.mxu0 %v1056_v38  ;;  %1684 = vmatprep.mubr.msk.bf16.mxu1 %vm1852_vm0, %v1851_v1  ;;  %v1586_v38 = vld [vmem:[%s2206_s8] ss:$0 sm:$0xff] }
 0x420   : > { %1688 = vmatprep.subr.bf16.mxu0 %v1851_v1 }
 0x421   : > { %v1782_v41 = vpop.eup %1781 }
 0x422   : > { %v945_v42 = vmul.f32 %v1782_v41, %v1774_v15 }
 0x424   : > { %v959_v45 = vpack.c.bf16 %v945_v42, %v945_v42  ;;  %v951_v46 = vsel %vm716_vm3, %v945_v42, 0.0 }
 0x425   : > { %v952_v47 = vadd.f32 %v951_v46, %v950_v43 }
 0x426   : > { %1679 = vmatmul.mubr.msk.bf16.vlgmr.msra.gmra.mrb[8].mxu0 %vm716_vm3, %v582_v44  ;;  %v1102_v48 = vsel %vm716_vm3, %v959_v45, 0 }
 0x427   : > { %1683 = vmatpush3.bf16.xpose.msra.mxu1 %v1102_v48  ;;  %1692 = vmatprep.mubr.msk.bf16.mxu0 %vm1852_vm0, %v1851_v1  ;;  %v954_v49 = vmul.f32 0.25, %v952_v47 }
 0x428   : > { %1696 = vmatprep.subr.bf16.mxu1 %v1851_v1  ;;  %1689 = vmatpush3.bf16.msra.mxu0 %v1759_v50 }
 0x429   : > { %955 = vst.msk [vmem:[%s2215_s26] sm:$0xff] %vm716_vm3, %v954_v49  ;;  %1690 = vmatprep.subr.bf16.mxu0 %v1851_v1  ;;  %s1462_s26 = scalar_lea.sflag [#allocation3], %s2233_s0 }
 0x42c   : > { %1691 = vmatpush3.bf16.msra.mxu0 %v1760_v51 }
 0x42d   : > { %1704 = vmatprep.subr.bf16.mxu0 %v1851_v1 }
 0x42e   : > { %1685 = vmatmul.mubr.msk.bf16.vlgmr.msra.gmra.mrb[20].mxu1 %vm716_vm3, %v583_v23 }
 0x42f   : > { %1700 = vmatprep.mubr.msk.bf16.mxu1 %vm1852_vm0, %v1851_v1  ;;  %1697 = vmatpush3.bf16.msra.mxu1 %v1761_v20 }
 0x430   : > { %1698 = vmatprep.subr.bf16.mxu1 %v1851_v1 }
 0x433   : > { %1699 = vmatpush3.bf16.msra.mxu1 %v1762_v25 }
 0x4e9   : > { %v1000_v24 = vpop.f32.mrb[4].mxu0 }
 0x4ea   : > { %1144 = vxpose.xlu1.b32.start [1/4] (short) (narrow) %v1000_v24, 8  ;;  %v1668_v52 = vpop.f32.mrb[5].mxu0 }
 0x4eb   : > { %v1003_v53 = vpop.f32.mrb[6].mxu0 }
 0x4ec   : > { %v1669_v54 = vpop.f32.mrb[7].mxu0 }
 0x4f1   : > { %v1046_v55 = vpop.f32.mrb[16].mxu1 }
 0x4f2   : > { %v1674_v56 = vpop.f32.mrb[17].mxu1  ;;  %1145 = vxpose.xlu1.b32.cont [2/4] (short) (narrow) %v1046_v55, 8 }
 0x4f3   : > { %v1049_v57 = vpop.f32.mrb[18].mxu1 }
 0x4f4   : > { %v1675_v58 = vpop.f32.mrb[19].mxu1 }
 0x4f9   : > { %v1092_v59 = vpop.f32.mrb[8].mxu0 }
 0x4fa   : > { %1146 = vxpose.xlu1.b32.cont [3/4] (short) (narrow) %v1092_v59, 8  ;;  %v1680_v60 = vpop.f32.mrb[9].mxu0 }
 0x4fb   : > { %v1095_v61 = vpop.f32.mrb[10].mxu0 }
 0x4fc   : > { %v1681_v62 = vpop.f32.mrb[11].mxu0 }
 0x501   : > { %v1138_v63 = vpop.f32.mrb[20].mxu1 }
 0x502   : > { %v1686_v0 = vpop.f32.mrb[21].mxu1  ;;  %1147 = vxpose.xlu1.b32.end [4/4] (short) (narrow) %v1138_v63, 8 }
 0x503   : > { %v1141_v2 = vpop.f32.mrb[22].mxu1 }
 0x504   : > { %v1687_v4 = vpop.f32.mrb[23].mxu1 }
 0x576   : > { %v1160_v5 = vpop.trf.xlu1 }
 0x577   : > { %v1176_v6 = vpack.c.bf16 %v1160_v5, %v1160_v5 }
 0x579   : > { %1693 = vmatmul.mubr.msk.bf16.vlgmr.msra.gmra.mrb[12].mxu0 %vm500_vm1, %v1176_v6 }
 0x57a   : > { %1712 = vmatprep.mubr.msk.bf16.mxu0 %vm1852_vm0, %v1851_v1 }
 0x64c   : > { %v1237_v8 = vpop.f32.mrb[12].mxu0 }
 0x64d   : > { %v1238_v9 = vadd.f32 %v1580_v7, %v1237_v8  ;;  %v1694_v10 = vpop.f32.mrb[13].mxu0 }
 0x64e   : > { %v1240_v11 = vpop.f32.mrb[14].mxu0 }
 0x64f   : > { %v1695_v12 = vpop.f32.mrb[15].mxu0  ;;  %v1243_v13 = vadd.f32 %v1238_v9, %v2001_v3  ;;  %v1763_v3 = vld [vmem:[%s2207_s9] sm:$0xff]  }
 0x650   : > { %1705 = vmatpush3.bf16.msra.mxu0 %v1763_v3 }
 0x651   : > { %v1246_v14 = vsel %vm500_vm1, %v1243_v13, 0.0  ;;  %1706 = vmatprep.subr.bf16.mxu0 %v1851_v1 }
 0x652   : > { %1247 = vadd.xlane.f32.xlu0 %v1246_v14 }
 0x654   : > { %1707 = vmatpush3.bf16.msra.mxu0 %v1764_v26 }
 0x655   : > { %1708 = vmatprep.subr.bf16.mxu0 %v1851_v1 }
 0x658   : > { %1709 = vmatpush3.bf16.msra.mxu0 %v1765_v36 }
 0x659   : > { %1710 = vmatprep.subr.bf16.mxu0 %v1851_v1  ;;  %v1590_v1 = vld [vmem:[%s2208_s10] ss:$0 sm:$0xff] }
 0x65c   : > { %1711 = vmatpush3.bf16.msra.mxu0 %v1766_v37 }
 0x6df   : > { %v1248_v15 = vpop.xlane.xlu0 %1247 }
 0x6e0   : > { %v1250_v16 = vmul.f32 0.03125, %v1248_v15 }
 0x6e2   : > { %v1251_v17 = vsub.f32 %v1243_v13, %v1250_v16 }
 0x6e4   : > { %v1252_v18 = vmul.f32 %v1251_v17, %v1251_v17 }
 0x6e6   : > { %v1253_v19 = vsel %vm500_vm1, %v1252_v18, 0.0 }
 0x6e7   : > { %1254 = vadd.xlane.f32.xlu0 %v1253_v19 }
 0x774   : > { %v1255_v27 = vpop.xlane.xlu0 %1254 }
 0x775   : > { %v1256_v28 = vmul.f32 0.03125, %v1255_v27 }
 0x777   : > { %v1257_v29 = vadd.f32 1e-05, %v1256_v28 }
 0x779   : > { %1783 = vrsqrt.f32 %v1257_v29 }
 0x783   : > { %v1784_v30 = vpop.eup %1783 }
 0x784   : > { %v1259_v32 = vmul.f32 %v1784_v30, %v1251_v17 }
 0x786   : > { %v1266_v34 = vmul.f32 %v1584_v31, %v1259_v32 }
 0x788   : > { %v1273_v35 = vadd.f32 %v1585_v33, %v1266_v34 }
 0x78a   : > { %v1274_v21 = vpack.c.bf16 %v1273_v35, %v1273_v35 }
 0x78c   : > { %1701 = vmatmul.mubr.msk.bf16.vlgmr.msra.gmra.mrb[24].mxu1 %vm500_vm1, %v1274_v21 }
 0x85f   : > { %v1335_v39 = vpop.f32.mrb[24].mxu1 }
 0x860   : > { %v1336_v40 = vadd.f32 %v1586_v38, %v1335_v39  ;;  %v1702_v41 = vpop.f32.mrb[25].mxu1 }
 0x861   : > { %v1338_v22 = vpop.f32.mrb[26].mxu1 }
 0x862   : > { %v1341_v42 = vmax.f32 %v1336_v40, 0.0  ;;  %v1703_v43 = vpop.f32.mrb[27].mxu1 }
 0x864   : > { %v1342_v44 = vpack.c.bf16 %v1341_v42, %v1341_v42 }
 0x866   : > { %1713 = vmatmul.mubr.msk.bf16.vlgmr.msra.gmra.mrb[16].mxu0 %vm1382_vm4, %v1342_v44 }
 0x939   : > { %v1420_v45 = vpop.f32.mrb[16].mxu0 }
 0x93a   : > { %v1421_v46 = vadd.f32 %v1590_v1, %v1420_v45  ;;  %v1714_v47 = vpop.f32.mrb[17].mxu0 }
 0x93b   : > { %v1423_v48 = vpop.f32.mrb[18].mxu0 }
 0x93c   : > { %v1715_v49 = vpop.f32.mrb[19].mxu0  ;;  %v1426_v23 = vadd.f32 %v1421_v46, %v1273_v35 }
 0x93e   : > { %v1429_v50 = vsel %vm500_vm1, %v1426_v23, 0.0 }
 0x93f   : > { %1430 = vadd.xlane.f32.xlu0 %v1429_v50 }
 0x9cc   : > { %v1431_v51 = vpop.xlane.xlu0 %1430 }
 0x9cd   : > { %v1432_v24 = vmul.f32 0.03125, %v1431_v51 }
 0x9cf   : > { %v1433_v52 = vsub.f32 %v1426_v23, %v1432_v24 }
 0x9d1   : > { %v1434_v53 = vmul.f32 %v1433_v52, %v1433_v52 }
 0x9d3   : > { %v1435_v54 = vsel %vm500_vm1, %v1434_v53, 0.0 }
 0x9d4   : > { %1436 = vadd.xlane.f32.xlu0 %v1435_v54 }
 0x9d5   : > { %1800 = shalt.err (!%p1797_p3)
}
 0x9d6   : > { %s1801_s17 = scalar_lea.hbm %s2148_s28, 128  ;;  %s1805_s4 = scalar_lea.hbm %s2212_s14, 256 }
 0x9d7   : > { %p1802_p4 = scmp.ne.s32.totalorder %s2148_s28, %s1801_s17  ;;  %p1806_p9 = scmp.lt.u32.totalorder %s2148_s28, %s2212_s14 }
 0x9d8   : > { %p1807_p10 = scmp.lt.u32.totalorder %s1805_s4, %s1801_s17  ;;  %p1809_p12 = scmp.lt.u32.totalorder %s1801_s17, %s2148_s28 }
 0x9d9   : > { %p1803_p7 = pnand %p1802_p4, %p1967_p5 }
 0x9da   : > { %p1808_p11 = por %p1807_p10, %p1806_p9 }
 0x9db   : > { %p1804_p8 = pneg %p1803_p7 }
 0x9dc   : > { %p1810_p13 = por %p1809_p12, %p1808_p11 }
 0x9de   : > { %p1811_p0 = pnand %p1810_p13, %p1804_p8 }
 0x9e0   : > { %1814 = shalt.err (!%p1811_p0)
}
 0x9e1   : > { %1716 = dma.vmem_to_hbm [thread:$0]  (%p1967_p5), %s1479_s20, 128, %s2148_s28, %s1462_s26   ;;  %v1596_v59 = vld [vmem:[%s2209_s11] ss:$0 sm:$0xff] }
 0x9e2   : > { %v1597_v61 = vld [vmem:[%s2210_s12] ss:$0 sm:$0xff]  ;;  %s2234_s0 = sshll.u32 %s1992_s18, 3 }
 0x9e3   : > { %s473_s20 = scalar_lea.vmem %s2211_s13, %s2234_s0 }
 0xa61   : > { %v1437_v55 = vpop.xlane.xlu0 %1436 }
 0xa62   : > { %v1438_v56 = vmul.f32 0.03125, %v1437_v55 }
 0xa64   : > { %v1439_v57 = vadd.f32 1e-05, %v1438_v56 }
 0xa66   : > { %1785 = vrsqrt.f32 %v1439_v57 }
 0xa70   : > { %v1786_v58 = vpop.eup %1785 }
 0xa71   : > { %v1441_v60 = vmul.f32 %v1786_v58, %v1433_v52 }
 0xa73   : > { %v1448_v62 = vmul.f32 %v1596_v59, %v1441_v60 }
 0xa75   : > { %v1455_v63 = vadd.f32 %v1597_v61, %v1448_v62 }
 0xa77   : > { %1456 = vst.msk [vmem:[%s473_s20] sm:$0xff] %vm500_vm1, %v1455_v63 }
 0xa78 PF: > { %p1722_p5 = scmp.ge.s32.totalorder %s1849_s16, 2  ;;  %s1497_s28 = sand.u32 1, %s1837_s29  }
 0xa79   : > { %s1498_s26 = scalar_lea.sflag [#allocation3], %s1497_s28 }
 0xa7a   : > { %p1719_p1 = pnand %p1722_p5, %p1971_p6 }
 0xa7c   : > { %1832 = dma.done.wait (!%p1719_p1), %s1498_s26, 128  }
 0xa7d   : > { %1834 = vsyncadd (!%p1719_p1), %s1498_s26, 4294967168  ;;  %p25_p2 = scmp.ge.s32.totalorder %s1954_s19, 4   ;;  %s2235_s29 = smov %s1841_s30 }
 0xa7e   : > { %s2236_s30 = smov %s1845_s15  ;;  %s2237_s15 = smov %s1965_s22 }
 0xa7f   : > { %s2238_s16 = smov %s1954_s19  ;;  %27 = sbr.rel (!%p25_p2) target bundleno = 11 (0xb), region = 119 }
 0xa86   :  { %1503 = vsyncpa [#allocation3], 1 }
 0xa87   :  { %1505 = vsyncpa [#allocation3 + $0x1], 1 }

</bundles_post_ra>
